<compile_context>
chip_gen: v7x
topology: tpu7x:2x2x1
jax: 0.10.0
libtpu: 0.0.40
codegen_flags: <defaults>
</compile_context>

<pallas_src>
import math

import jax
import jax.numpy as jnp
from jax.experimental import pallas as pl
from jax.experimental.pallas import tpu as pltpu


D_IN = 28 * 28          # 784
D_PAD = 896             # 7 * 128  (lane-aligned feature width)
LAYER_DIMS = [           # (fan_in, fan_out), PyTorch layer order
    (D_IN, 128), (128, 64), (64, 32),      # encoder
    (32, 64), (64, 128), (128, D_IN),      # decoder
]


def _round_up(n, m):
    return ((n + m - 1) // m) * m


def autoencoder_kernel(
    x_ref,
    w1_ref, b1_ref,
    w2_ref, b2_ref,
    w3_ref, b3_ref,
    w4_ref, b4_ref,
    w5_ref, b5_ref,
    w6_ref, b6_ref,
    out_ref,
):
    """One batch tile: 6 matmuls (bf16 operands, f32 accumulate) + ReLU / Sigmoid in f32."""
    x = x_ref[...].astype(jnp.bfloat16)                       # (TB, 896)

    # ----- encoder -----
    h = jnp.dot(x, w1_ref[...], preferred_element_type=jnp.float32) + b1_ref[...]
    h = jnp.maximum(h, 0.0)                                   # (TB, 128)
    h = jnp.dot(h.astype(jnp.bfloat16), w2_ref[...],
                preferred_element_type=jnp.float32) + b2_ref[...]
    h = jnp.maximum(h, 0.0)                                   # (TB, 64)
    h = jnp.dot(h.astype(jnp.bfloat16), w3_ref[...],
                preferred_element_type=jnp.float32) + b3_ref[...]
    h = jnp.maximum(h, 0.0)                                   # (TB, 32) == encoded

    # ----- decoder -----
    h = jnp.dot(h.astype(jnp.bfloat16), w4_ref[...],
                preferred_element_type=jnp.float32) + b4_ref[...]
    h = jnp.maximum(h, 0.0)                                   # (TB, 64)
    h = jnp.dot(h.astype(jnp.bfloat16), w5_ref[...],
                preferred_element_type=jnp.float32) + b5_ref[...]
    h = jnp.maximum(h, 0.0)                                   # (TB, 128)
    h = jnp.dot(h.astype(jnp.bfloat16), w6_ref[...],
                preferred_element_type=jnp.float32) + b6_ref[...]

    # Sigmoid: exp on the EUP, approximate reciprocal also on the EUP slot.
    e = jnp.exp(-h)
    out_ref[...] = pl.reciprocal(1.0 + e, approx=True)        # (TB, 896)


def autoencoder_forward(x, params, *, tb=256):
    """x: (B, 1, 28, 28) or (B, 784) float32. Returns (B, 784) float32."""
    B = x.shape[0]
    x_flat = x.reshape(B, D_IN).astype(jnp.float32)           # nn.Flatten()

    # Lane-align the feature dim: 784 -> 896 (zero pad; W1's extra rows are zero too).
    x_pad = jnp.pad(x_flat, ((0, 0), (0, D_PAD - D_IN)))

    # Batch tile: multiple of 8 sublanes; pad batch so the grid divides evenly.
    tb = min(tb, _round_up(B, 8))
    b_pad = _round_up(B, tb)
    if b_pad != B:
        x_pad = jnp.pad(x_pad, ((0, b_pad - B), (0, 0)))

    # Pad + cast weights (bf16). Layer-1 rows and layer-6 cols / bias padded to 896.
    (w1, b1), (w2, b2), (w3, b3), (w4, b4), (w5, b5), (w6, b6) = params
    w1p = jnp.pad(w1, ((0, D_PAD - D_IN), (0, 0))).astype(jnp.bfloat16)
    w6p = jnp.pad(w6, ((0, 0), (0, D_PAD - D_IN))).astype(jnp.bfloat16)
    b6p = jnp.pad(b6, ((0, 0), (0, D_PAD - D_IN)))
    weights = [w1p, w2.astype(jnp.bfloat16), w3.astype(jnp.bfloat16),
               w4.astype(jnp.bfloat16), w5.astype(jnp.bfloat16), w6p]
    biases = [b1, b2, b3, b4, b5, b6p]                        # biases stay f32

    operands = [x_pad]
    in_specs = [pl.BlockSpec((tb, D_PAD), lambda i: (i, 0))]  # batch-tiled activations
    for w, b in zip(weights, biases):
        operands += [w, b]
        # Same block index every grid step -> weights/biases stay resident in VMEM.
        in_specs += [pl.BlockSpec(w.shape, lambda i: (0, 0)),
                     pl.BlockSpec(b.shape, lambda i: (0, 0))]

    flops_per_row = 2 * sum(din * dout for din, dout in LAYER_DIMS)
    weight_bytes = (sum(int(w.size) * w.dtype.itemsize for w in weights)
                    + sum(int(b.size) * b.dtype.itemsize for b in biases))
    cost = pl.CostEstimate(
        flops=flops_per_row * b_pad,
        transcendentals=b_pad * D_PAD,
        bytes_accessed=weight_bytes + 2 * b_pad * D_PAD * 4,
    )

    out_pad = pl.pallas_call(
        autoencoder_kernel,
        out_shape=jax.ShapeDtypeStruct((b_pad, D_PAD), jnp.float32),
        grid=(b_pad // tb,),
        in_specs=in_specs,
        out_specs=pl.BlockSpec((tb, D_PAD), lambda i: (i, 0)),
        compiler_params=pltpu.CompilerParams(
            dimension_semantics=("parallel",)),
        cost_estimate=cost,
    )(*operands)

    return out_pad[:B, :D_IN]


def init_params(key):
    """Deterministic init mimicking torch.nn.Linear (uniform +/- 1/sqrt(fan_in)).

    Weights stored as (in_features, out_features) so the kernel does x @ W + b.
    """
    params = []
    for (fan_in, fan_out) in LAYER_DIMS:
        key, kw, kb = jax.random.split(key, 3)
        bound = 1.0 / math.sqrt(fan_in)
        w = jax.random.uniform(kw, (fan_in, fan_out), jnp.float32, -bound, bound)
        b = jax.random.uniform(kb, (1, fan_out), jnp.float32, -bound, bound)
        params.append((w, b))
    return params


if __name__ == "__main__":
    key = jax.random.PRNGKey(0)
    key, xkey = jax.random.split(key)

    B = 16
    x = jax.random.normal(xkey, (B, 1, 28, 28), jnp.float32)

    params = init_params(key)

    out = autoencoder_forward(x, params)
    out = jax.block_until_ready(out)

    assert out.shape == (B, D_IN)
    assert out.dtype == jnp.float32
    assert bool(jnp.all(jnp.isfinite(out)))
    # Sigmoid output (approx reciprocal) must lie in [0, 1] up to tiny tolerance.
    assert bool(jnp.all(out >= -1e-4)) and bool(jnp.all(out <= 1.0 + 1e-3))

    print("KERNEL_OK")
</pallas_src>

<mosaic_0001>
module attributes {stable_mosaic.version = 11 : i64} {
  func.func @autoencoder_kernel(%arg0: i32, %arg1: memref<16x896xf32, #tpu.memory_space<vmem>>, %arg2: memref<896x128xbf16, #tpu.memory_space<vmem>>, %arg3: memref<1x128xf32, #tpu.memory_space<vmem>>, %arg4: memref<128x64xbf16, #tpu.memory_space<vmem>>, %arg5: memref<1x64xf32, #tpu.memory_space<vmem>>, %arg6: memref<64x32xbf16, #tpu.memory_space<vmem>>, %arg7: memref<1x32xf32, #tpu.memory_space<vmem>>, %arg8: memref<32x64xbf16, #tpu.memory_space<vmem>>, %arg9: memref<1x64xf32, #tpu.memory_space<vmem>>, %arg10: memref<64x128xbf16, #tpu.memory_space<vmem>>, %arg11: memref<1x128xf32, #tpu.memory_space<vmem>>, %arg12: memref<128x896xbf16, #tpu.memory_space<vmem>>, %arg13: memref<1x896xf32, #tpu.memory_space<vmem>>, %arg14: memref<16x896xf32, #tpu.memory_space<vmem>>) attributes {dimension_semantics = [#tpu.dimension_semantics<parallel>], iteration_bounds = array<i64: 1>, scalar_prefetch = 0 : i64, scratch_operands = 0 : i64, tpu.core_type = #tpu.core_type<tc>, window_params = [{transform_indices = @transform_0, window_bounds = array<i64: 16, 896>}, {pipeline_mode = #tpu.pipeline_mode<synchronous>, transform_indices = @transform_1, window_bounds = array<i64: 896, 128>}, {pipeline_mode = #tpu.pipeline_mode<synchronous>, transform_indices = @transform_2, window_bounds = array<i64: 1, 128>}, {pipeline_mode = #tpu.pipeline_mode<synchronous>, transform_indices = @transform_3, window_bounds = array<i64: 128, 64>}, {pipeline_mode = #tpu.pipeline_mode<synchronous>, transform_indices = @transform_4, window_bounds = array<i64: 1, 64>}, {pipeline_mode = #tpu.pipeline_mode<synchronous>, transform_indices = @transform_5, window_bounds = array<i64: 64, 32>}, {pipeline_mode = #tpu.pipeline_mode<synchronous>, transform_indices = @transform_6, window_bounds = array<i64: 1, 32>}, {pipeline_mode = #tpu.pipeline_mode<synchronous>, transform_indices = @transform_7, window_bounds = array<i64: 32, 64>}, {pipeline_mode = #tpu.pipeline_mode<synchronous>, transform_indices = @transform_8, window_bounds = array<i64: 1, 64>}, {pipeline_mode = #tpu.pipeline_mode<synchronous>, transform_indices = @transform_9, window_bounds = array<i64: 64, 128>}, {pipeline_mode = #tpu.pipeline_mode<synchronous>, transform_indices = @transform_10, window_bounds = array<i64: 1, 128>}, {pipeline_mode = #tpu.pipeline_mode<synchronous>, transform_indices = @transform_11, window_bounds = array<i64: 128, 896>}, {pipeline_mode = #tpu.pipeline_mode<synchronous>, transform_indices = @transform_12, window_bounds = array<i64: 1, 896>}, {transform_indices = @transform_13, window_bounds = array<i64: 16, 896>}]} {
    %c0 = arith.constant 0 : index
    %c0_0 = arith.constant 0 : index
    %0 = vector.load %arg1[%c0, %c0_0] : memref<16x896xf32, #tpu.memory_space<vmem>>, vector<16x896xf32>
    %1 = arith.truncf %0 : vector<16x896xf32> to vector<16x896xbf16>
    %c0_1 = arith.constant 0 : index
    %c0_2 = arith.constant 0 : index
    %2 = vector.load %arg2[%c0_1, %c0_2] : memref<896x128xbf16, #tpu.memory_space<vmem>>, vector<896x128xbf16>
    %cst = arith.constant dense<0.000000e+00> : vector<16x128xf32>
    %3 = tpu.matmul %1, %2, %cst {dimension_numbers = #tpu.dot_dimension_numbers<[1], [0], [0], [1], [0, 0, 1, 1], [], []>} : vector<16x896xbf16>, vector<896x128xbf16>, vector<16x128xf32> -> vector<16x128xf32>
    %c0_3 = arith.constant 0 : index
    %c0_4 = arith.constant 0 : index
    %4 = vector.load %arg3[%c0_3, %c0_4] : memref<1x128xf32, #tpu.memory_space<vmem>>, vector<1x128xf32>
    %5 = vector.broadcast %4 : vector<1x128xf32> to vector<16x128xf32>
    %6 = arith.addf %3, %5 : vector<16x128xf32>
    %cst_5 = arith.constant 0.000000e+00 : f32
    %7 = vector.broadcast %cst_5 : f32 to vector<16x128xf32>
    %8 = arith.maximumf %6, %7 : vector<16x128xf32>
    %9 = arith.truncf %8 : vector<16x128xf32> to vector<16x128xbf16>
    %c0_6 = arith.constant 0 : index
    %c0_7 = arith.constant 0 : index
    %10 = vector.load %arg4[%c0_6, %c0_7] : memref<128x64xbf16, #tpu.memory_space<vmem>>, vector<128x64xbf16>
    %cst_8 = arith.constant dense<0.000000e+00> : vector<16x64xf32>
    %11 = tpu.matmul %9, %10, %cst_8 {dimension_numbers = #tpu.dot_dimension_numbers<[1], [0], [0], [1], [0, 0, 1, 1], [], []>} : vector<16x128xbf16>, vector<128x64xbf16>, vector<16x64xf32> -> vector<16x64xf32>
    %c0_9 = arith.constant 0 : index
    %c0_10 = arith.constant 0 : index
    %12 = vector.load %arg5[%c0_9, %c0_10] : memref<1x64xf32, #tpu.memory_space<vmem>>, vector<1x64xf32>
    %13 = vector.broadcast %12 : vector<1x64xf32> to vector<16x64xf32>
    %14 = arith.addf %11, %13 : vector<16x64xf32>
    %cst_11 = arith.constant 0.000000e+00 : f32
    %15 = vector.broadcast %cst_11 : f32 to vector<16x64xf32>
    %16 = arith.maximumf %14, %15 : vector<16x64xf32>
    %17 = arith.truncf %16 : vector<16x64xf32> to vector<16x64xbf16>
    %c0_12 = arith.constant 0 : index
    %c0_13 = arith.constant 0 : index
    %18 = vector.load %arg6[%c0_12, %c0_13] : memref<64x32xbf16, #tpu.memory_space<vmem>>, vector<64x32xbf16>
    %cst_14 = arith.constant dense<0.000000e+00> : vector<16x32xf32>
    %19 = tpu.matmul %17, %18, %cst_14 {dimension_numbers = #tpu.dot_dimension_numbers<[1], [0], [0], [1], [0, 0, 1, 1], [], []>} : vector<16x64xbf16>, vector<64x32xbf16>, vector<16x32xf32> -> vector<16x32xf32>
    %c0_15 = arith.constant 0 : index
    %c0_16 = arith.constant 0 : index
    %20 = vector.load %arg7[%c0_15, %c0_16] : memref<1x32xf32, #tpu.memory_space<vmem>>, vector<1x32xf32>
    %21 = vector.broadcast %20 : vector<1x32xf32> to vector<16x32xf32>
    %22 = arith.addf %19, %21 : vector<16x32xf32>
    %cst_17 = arith.constant 0.000000e+00 : f32
    %23 = vector.broadcast %cst_17 : f32 to vector<16x32xf32>
    %24 = arith.maximumf %22, %23 : vector<16x32xf32>
    %25 = arith.truncf %24 : vector<16x32xf32> to vector<16x32xbf16>
    %c0_18 = arith.constant 0 : index
    %c0_19 = arith.constant 0 : index
    %26 = vector.load %arg8[%c0_18, %c0_19] : memref<32x64xbf16, #tpu.memory_space<vmem>>, vector<32x64xbf16>
    %cst_20 = arith.constant dense<0.000000e+00> : vector<16x64xf32>
    %27 = tpu.matmul %25, %26, %cst_20 {dimension_numbers = #tpu.dot_dimension_numbers<[1], [0], [0], [1], [0, 0, 1, 1], [], []>} : vector<16x32xbf16>, vector<32x64xbf16>, vector<16x64xf32> -> vector<16x64xf32>
    %c0_21 = arith.constant 0 : index
    %c0_22 = arith.constant 0 : index
    %28 = vector.load %arg9[%c0_21, %c0_22] : memref<1x64xf32, #tpu.memory_space<vmem>>, vector<1x64xf32>
    %29 = vector.broadcast %28 : vector<1x64xf32> to vector<16x64xf32>
    %30 = arith.addf %27, %29 : vector<16x64xf32>
    %cst_23 = arith.constant 0.000000e+00 : f32
    %31 = vector.broadcast %cst_23 : f32 to vector<16x64xf32>
    %32 = arith.maximumf %30, %31 : vector<16x64xf32>
    %33 = arith.truncf %32 : vector<16x64xf32> to vector<16x64xbf16>
    %c0_24 = arith.constant 0 : index
    %c0_25 = arith.constant 0 : index
    %34 = vector.load %arg10[%c0_24, %c0_25] : memref<64x128xbf16, #tpu.memory_space<vmem>>, vector<64x128xbf16>
    %cst_26 = arith.constant dense<0.000000e+00> : vector<16x128xf32>
    %35 = tpu.matmul %33, %34, %cst_26 {dimension_numbers = #tpu.dot_dimension_numbers<[1], [0], [0], [1], [0, 0, 1, 1], [], []>} : vector<16x64xbf16>, vector<64x128xbf16>, vector<16x128xf32> -> vector<16x128xf32>
    %c0_27 = arith.constant 0 : index
    %c0_28 = arith.constant 0 : index
    %36 = vector.load %arg11[%c0_27, %c0_28] : memref<1x128xf32, #tpu.memory_space<vmem>>, vector<1x128xf32>
    %37 = vector.broadcast %36 : vector<1x128xf32> to vector<16x128xf32>
    %38 = arith.addf %35, %37 : vector<16x128xf32>
    %cst_29 = arith.constant 0.000000e+00 : f32
    %39 = vector.broadcast %cst_29 : f32 to vector<16x128xf32>
    %40 = arith.maximumf %38, %39 : vector<16x128xf32>
    %41 = arith.truncf %40 : vector<16x128xf32> to vector<16x128xbf16>
    %c0_30 = arith.constant 0 : index
    %c0_31 = arith.constant 0 : index
    %42 = vector.load %arg12[%c0_30, %c0_31] : memref<128x896xbf16, #tpu.memory_space<vmem>>, vector<128x896xbf16>
    %cst_32 = arith.constant dense<0.000000e+00> : vector<16x896xf32>
    %43 = tpu.matmul %41, %42, %cst_32 {dimension_numbers = #tpu.dot_dimension_numbers<[1], [0], [0], [1], [0, 0, 1, 1], [], []>} : vector<16x128xbf16>, vector<128x896xbf16>, vector<16x896xf32> -> vector<16x896xf32>
    %c0_33 = arith.constant 0 : index
    %c0_34 = arith.constant 0 : index
    %44 = vector.load %arg13[%c0_33, %c0_34] : memref<1x896xf32, #tpu.memory_space<vmem>>, vector<1x896xf32>
    %45 = vector.broadcast %44 : vector<1x896xf32> to vector<16x896xf32>
    %46 = arith.addf %43, %45 : vector<16x896xf32>
    %cst_35 = arith.constant 0.000000e+00 : f32
    %47 = vector.broadcast %cst_35 : f32 to vector<16x896xf32>
    %48 = arith.subf %47, %46 : vector<16x896xf32>
    %49 = math.exp %48 : vector<16x896xf32>
    %cst_36 = arith.constant 1.000000e+00 : f32
    %50 = vector.broadcast %cst_36 : f32 to vector<16x896xf32>
    %51 = arith.addf %50, %49 : vector<16x896xf32>
    %52 = tpu.reciprocal %51 {approx = true} : vector<16x896xf32> -> vector<16x896xf32>
    %c0_37 = arith.constant 0 : index
    %c0_38 = arith.constant 0 : index
    %53 = vector.load %arg14[%c0_37, %c0_38] : memref<16x896xf32, #tpu.memory_space<vmem>>, vector<16x896xf32>
    tpu.vector_store %arg14[%c0_37, %c0_38], %52 {strides = array<i32>} : memref<16x896xf32, #tpu.memory_space<vmem>>, vector<16x896xf32>,
    return
  }
  func.func @transform_0(%arg0: i32) -> (i32, i32) {
    %c0_i32 = arith.constant 0 : i32
    %c0_i32_0 = arith.constant 0 : i32
    return %arg0, %c0_i32 : i32, i32
  }
  func.func @transform_1(%arg0: i32) -> (i32, i32) {
    %c0_i32 = arith.constant 0 : i32
    %c0_i32_0 = arith.constant 0 : i32
    %c0_i32_1 = arith.constant 0 : i32
    return %c0_i32, %c0_i32_0 : i32, i32
  }
  func.func @transform_2(%arg0: i32) -> (i32, i32) {
    %c0_i32 = arith.constant 0 : i32
    %c0_i32_0 = arith.constant 0 : i32
    %c0_i32_1 = arith.constant 0 : i32
    return %c0_i32, %c0_i32_0 : i32, i32
  }
  func.func @transform_3(%arg0: i32) -> (i32, i32) {
    %c0_i32 = arith.constant 0 : i32
    %c0_i32_0 = arith.constant 0 : i32
    %c0_i32_1 = arith.constant 0 : i32
    return %c0_i32, %c0_i32_0 : i32, i32
  }
  func.func @transform_4(%arg0: i32) -> (i32, i32) {
    %c0_i32 = arith.constant 0 : i32
    %c0_i32_0 = arith.constant 0 : i32
    %c0_i32_1 = arith.constant 0 : i32
    return %c0_i32, %c0_i32_0 : i32, i32
  }
  func.func @transform_5(%arg0: i32) -> (i32, i32) {
    %c0_i32 = arith.constant 0 : i32
    %c0_i32_0 = arith.constant 0 : i32
    %c0_i32_1 = arith.constant 0 : i32
    return %c0_i32, %c0_i32_0 : i32, i32
  }
  func.func @transform_6(%arg0: i32) -> (i32, i32) {
    %c0_i32 = arith.constant 0 : i32
    %c0_i32_0 = arith.constant 0 : i32
    %c0_i32_1 = arith.constant 0 : i32
    return %c0_i32, %c0_i32_0 : i32, i32
  }
  func.func @transform_7(%arg0: i32) -> (i32, i32) {
    %c0_i32 = arith.constant 0 : i32
    %c0_i32_0 = arith.constant 0 : i32
    %c0_i32_1 = arith.constant 0 : i32
    return %c0_i32, %c0_i32_0 : i32, i32
  }
  func.func @transform_8(%arg0: i32) -> (i32, i32) {
    %c0_i32 = arith.constant 0 : i32
    %c0_i32_0 = arith.constant 0 : i32
    %c0_i32_1 = arith.constant 0 : i32
    return %c0_i32, %c0_i32_0 : i32, i32
  }
  func.func @transform_9(%arg0: i32) -> (i32, i32) {
    %c0_i32 = arith.constant 0 : i32
    %c0_i32_0 = arith.constant 0 : i32
    %c0_i32_1 = arith.constant 0 : i32
    return %c0_i32, %c0_i32_0 : i32, i32
  }
  func.func @transform_10(%arg0: i32) -> (i32, i32) {
    %c0_i32 = arith.constant 0 : i32
    %c0_i32_0 = arith.constant 0 : i32
    %c0_i32_1 = arith.constant 0 : i32
    return %c0_i32, %c0_i32_0 : i32, i32
  }
  func.func @transform_11(%arg0: i32) -> (i32, i32) {
    %c0_i32 = arith.constant 0 : i32
    %c0_i32_0 = arith.constant 0 : i32
    %c0_i32_1 = arith.constant 0 : i32
    return %c0_i32, %c0_i32_0 : i32, i32
  }
  func.func @transform_12(%arg0: i32) -> (i32, i32) {
    %c0_i32 = arith.constant 0 : i32
    %c0_i32_0 = arith.constant 0 : i32
    %c0_i32_1 = arith.constant 0 : i32
    return %c0_i32, %c0_i32_0 : i32, i32
  }
  func.func @transform_13(%arg0: i32) -> (i32, i32) {
    %c0_i32 = arith.constant 0 : i32
    %c0_i32_0 = arith.constant 0 : i32
    return %arg0, %c0_i32 : i32, i32
  }
}

</mosaic_0001>

<bundles_post_ra>
// kernel: tpu_custom_call.1
= control target key start
LH: loop header
LB: loop body
LE: loop exit
PB: predicated region body
PF: predicated region fallthrough
CT: control target
= control target key end

     0   :  { %18 = vsyncpa [#allocation3], 0  ;;  %s2848_s0 = inlined_call_operand.vmem [shape: f32[16,896], index: 0, kind: input, shape index: {}]   ;;  %s2849_s1 = inlined_call_operand.hbm [shape: bf16[896,128], index: 1, kind: input, shape index: {}]   ;;  %s2850_s2 = inlined_call_operand.vmem [shape: f32[1,128], index: 2, kind: input, shape index: {}]   ;;  %s2851_s3 = inlined_call_operand.vmem [shape: bf16[128,64], index: 3, kind: input, shape index: {}]   ;;  %s2852_s4 = inlined_call_operand.vmem [shape: f32[1,64], index: 4, kind: input, shape index: {}]   ;;  %s2853_s5 = inlined_call_operand.vmem [shape: bf16[64,32], index: 5, kind: input, shape index: {}]   ;;  %s2854_s6 = inlined_call_operand.hbm [shape: f32[1,32], index: 6, kind: input, shape index: {}]   ;;  %s2855_s7 = inlined_call_operand.hbm [shape: bf16[32,64], index: 7, kind: input, shape index: {}]   ;;  %s2856_s8 = inlined_call_operand.hbm [shape: f32[1,64], index: 8, kind: input, shape index: {}]   ;;  %s2857_s9 = inlined_call_operand.vmem [shape: bf16[64,128], index: 9, kind: input, shape index: {}]   ;;  %s2858_s10 = inlined_call_operand.hbm [shape: f32[1,128], index: 10, kind: input, shape index: {}]   ;;  %s2859_s11 = inlined_call_operand.hbm [shape: bf16[128,896], index: 11, kind: input, shape index: {}]   ;;  %s2860_s12 = inlined_call_operand.vmem [shape: f32[1,896], index: 12, kind: input, shape index: {}]   ;;  %s2861_s13 = inlined_call_operand.hbm [shape: f32[16,896], index: 13, kind: output, shape index: {}]  }
   0x1   :  { %19 = vsyncpa [#allocation6], 0 }
   0x2   :  { %20 = vsyncpa [#allocation9], 0 }
   0x3   :  { %21 = vsyncpa [#allocation12], 0 }
   0x4   :  { %22 = vsyncpa [#allocation4], 0  ;;  %s2513_s25 = smov [#allocation5]   ;;  %s2514_s27 = smov [#allocation8]  }
   0x5   :  { %s51_s26 = sshll.u32 %s2513_s25, 4  ;;  %s73_s28 = sshll.u32 %s2514_s27, 4  ;;  %s52_s26 = int_to_ptr.vmem [resolvable:$true] %s51_s26  ;;  %s74_s28 = int_to_ptr.vmem [resolvable:$true] %s73_s28 }
   0x6   :  { %s2349_s14 = scalar_lea.hbm %s2854_s6, 16 }
   0x7   :  { %p2350_p0 = scmp.ne.s32.totalorder %s2854_s6, %s2349_s14  ;;  %p2353_p1 = scmp.lt.u32.totalorder %s2349_s14, %s2854_s6 }
   0x9   :  { %p2355_p2 = pnand %p2353_p1, %p2350_p0 }
   0xb   :  { %2358 = shalt.err (!%p2355_p2)
}
   0xc   :  { %s2359_s19 = scalar_lea.vmem %s52_s26, 16  ;;  %s2363_s20 = scalar_lea.vmem %s52_s26, 32 }
   0xd   :  { %p2360_p3 = scmp.ne.s32.totalorder %s52_s26, %s2359_s19  ;;  %p2364_p4 = scmp.lt.s32.totalorder %s52_s26, %s52_s26 }
   0xe   :  { %p2365_p5 = scmp.lt.s32.totalorder %s2363_s20, %s2359_s19 }
  0x10   :  { %p2366_p6 = por %p2365_p5, %p2364_p4 }
  0x12   :  { %p2367_p7 = pnand %p2366_p6, %p2360_p3 }
  0x14   :  { %2370 = shalt.err (!%p2367_p7)
}
  0x15   :  { %54 = dma.hbm_to_vmem [thread:$0]  %s2854_s6, 16, %s52_s26, [#allocation6]  }
  0x16   :  { %s2371_s25 = scalar_lea.hbm %s2856_s8, 16 }
  0x17   :  { %p2372_p8 = scmp.ne.s32.totalorder %s2856_s8, %s2371_s25  ;;  %p2375_p9 = scmp.lt.u32.totalorder %s2371_s25, %s2856_s8 }
  0x19   :  { %p2377_p10 = pnand %p2375_p9, %p2372_p8 }
  0x1b   :  { %2380 = shalt.err (!%p2377_p10)
}
  0x1c   :  { %s2381_s15 = scalar_lea.vmem %s74_s28, 16  ;;  %s2385_s16 = scalar_lea.vmem %s74_s28, 32 }
  0x1d   :  { %p2382_p11 = scmp.ne.s32.totalorder %s74_s28, %s2381_s15  ;;  %p2386_p12 = scmp.lt.s32.totalorder %s74_s28, %s74_s28 }
  0x1e   :  { %p2387_p13 = scmp.lt.s32.totalorder %s2385_s16, %s2381_s15 }
  0x20   :  { %p2388_p0 = por %p2387_p13, %p2386_p12 }
  0x22   :  { %p2389_p1 = pnand %p2388_p0, %p2382_p11 }
  0x24   :  { %2392 = shalt.err (!%p2389_p1)
}
  0x25   :  { %76 = dma.hbm_to_vmem [thread:$0]  %s2856_s8, 16, %s74_s28, [#allocation9]  }
  0x26   :  { %s2515_s17 = smov [#allocation2]   ;;  %s2393_s21 = scalar_lea.hbm %s2849_s1, 7168 }
  0x27   :  { %s30_s18 = sshll.u32 %s2515_s17, 4  ;;  %p2394_p2 = scmp.ne.s32.totalorder %s2849_s1, %s2393_s21  ;;  %s31_s18 = int_to_ptr.vmem [resolvable:$true] %s30_s18 }
  0x28   :  { %p2397_p3 = scmp.lt.u32.totalorder %s2393_s21, %s2849_s1 }
  0x2a   :  { %p2399_p4 = pnand %p2397_p3, %p2394_p2 }
  0x2c   :  { %2402 = shalt.err (!%p2399_p4)
}
  0x2d   :  { %s2403_s27 = scalar_lea.vmem %s31_s18, 7168  ;;  %p2408_p6 = scmp.lt.s32.totalorder %s31_s18, %s31_s18 }
  0x2e   :  { %p2404_p5 = scmp.ne.s32.totalorder %s31_s18, %s2403_s27  ;;  %p2409_p7 = scmp.lt.s32.totalorder %s2403_s27, %s2403_s27 }
  0x30   :  { %p2410_p8 = por %p2409_p7, %p2408_p6 }
  0x32   :  { %p2411_p9 = pnand %p2410_p8, %p2404_p5 }
  0x34   :  { %2414 = shalt.err (!%p2411_p9)
}
  0x35   :  { %s2516_s8 = smov 64   ;;  %s2517_s28 = smov 4  }
  0x36   :  { %36 = dma.hbm_to_vmem [thread:$0]  %s2849_s1, 7168, %s31_s18, [#allocation3], %s2516_s8, %s2516_s8, %s2517_s28  }
  0x37   :  { %s2518_s14 = smov [#allocation7]   ;;  %s2519_s16 = smov [#allocation10]  }
  0x38   :  { %s60_s15 = sshll.u32 %s2518_s14, 4  ;;  %s85_s6 = sshll.u32 %s2519_s16, 4  ;;  %s61_s15 = int_to_ptr.vmem [resolvable:$true] %s60_s15  ;;  %s86_s6 = int_to_ptr.vmem [resolvable:$true] %s85_s6 }
  0x39   :  { %s2415_s19 = scalar_lea.hbm %s2855_s7, 256 }
  0x3a   :  { %p2416_p10 = scmp.ne.s32.totalorder %s2855_s7, %s2415_s19  ;;  %p2419_p11 = scmp.lt.u32.totalorder %s2415_s19, %s2855_s7 }
  0x3c   :  { %p2421_p12 = pnand %p2419_p11, %p2416_p10 }
  0x3e   :  { %2424 = shalt.err (!%p2421_p12)
}
  0x3f   :  { %s2425_s1 = scalar_lea.vmem %s61_s15, 256  ;;  %p2430_p0 = scmp.lt.s32.totalorder %s61_s15, %s61_s15 }
  0x40   :  { %p2426_p13 = scmp.ne.s32.totalorder %s61_s15, %s2425_s1  ;;  %p2431_p1 = scmp.lt.s32.totalorder %s2425_s1, %s2425_s1 }
  0x42   :  { %p2432_p2 = por %p2431_p1, %p2430_p0 }
  0x44   :  { %p2433_p3 = pnand %p2432_p2, %p2426_p13 }
  0x46   :  { %2436 = shalt.err (!%p2433_p3)
}
  0x47   :  { %66 = dma.hbm_to_vmem [thread:$0]  %s2855_s7, 256, %s61_s15, [#allocation6], %s2516_s8, %s2516_s8, %s2517_s28  }
  0x48   :  { %s2437_s29 = scalar_lea.hbm %s2858_s10, 16 }
  0x49   :  { %p2438_p4 = scmp.ne.s32.totalorder %s2858_s10, %s2437_s29  ;;  %p2441_p5 = scmp.lt.u32.totalorder %s2437_s29, %s2858_s10 }
  0x4b   :  { %p2443_p6 = pnand %p2441_p5, %p2438_p4 }
  0x4d   :  { %2446 = shalt.err (!%p2443_p6)
}
  0x4e   :  { %s2447_s17 = scalar_lea.vmem %s86_s6, 16  ;;  %s2451_s19 = scalar_lea.vmem %s86_s6, 32 }
  0x4f   :  { %p2448_p7 = scmp.ne.s32.totalorder %s86_s6, %s2447_s17  ;;  %p2452_p8 = scmp.lt.s32.totalorder %s86_s6, %s86_s6 }
  0x50   :  { %p2453_p9 = scmp.lt.s32.totalorder %s2451_s19, %s2447_s17 }
  0x52   :  { %p2454_p10 = por %p2453_p9, %p2452_p8 }
  0x54   :  { %p2455_p11 = pnand %p2454_p10, %p2448_p7 }
  0x56   :  { %2458 = shalt.err (!%p2455_p11)
}
  0x57   :  { %88 = dma.hbm_to_vmem [thread:$0]  %s2858_s10, 16, %s86_s6, [#allocation9]  }
  0x58   :  { %s2520_s28 = smov [#allocation11]   ;;  %s2459_s22 = scalar_lea.hbm %s2859_s11, 7168 }
  0x59   :  { %s94_s15 = sshll.u32 %s2520_s28, 4  ;;  %p2460_p12 = scmp.ne.s32.totalorder %s2859_s11, %s2459_s22  ;;  %s95_s15 = int_to_ptr.vmem [resolvable:$true] %s94_s15 }
  0x5a   :  { %p2463_p13 = scmp.lt.u32.totalorder %s2459_s22, %s2859_s11 }
  0x5c   :  { %p2465_p0 = pnand %p2463_p13, %p2460_p12 }
  0x5e   :  { %2468 = shalt.err (!%p2465_p0)
}
  0x5f   :  { %s2469_s25 = scalar_lea.vmem %s95_s15, 7168  ;;  %p2474_p2 = scmp.lt.s32.totalorder %s95_s15, %s95_s15 }
  0x60   :  { %p2470_p1 = scmp.ne.s32.totalorder %s95_s15, %s2469_s25  ;;  %p2475_p3 = scmp.lt.s32.totalorder %s2469_s25, %s2469_s25 }
  0x62   :  { %p2476_p4 = por %p2475_p3, %p2474_p2 }
  0x64   :  { %p2477_p5 = pnand %p2476_p4, %p2470_p1 }
  0x66   :  { %2480 = shalt.err (!%p2477_p5)
}
  0x67   :  { %s2521_s10 = smov 448   ;;  %s2522_s6 = smov 28  }
  0x68   :  { %100 = dma.hbm_to_vmem [thread:$0]  %s2859_s11, 7168, %s95_s15, [#allocation12], %s2521_s10, %s2521_s10, %s2522_s6  }
  0x69   :  { %2503 = dma.done.wait [#allocation3], 7168  }
  0x6a   :  { %2504 = vsyncadd [#allocation3], 4294960128 }
  0x6b   :  { %2505 = dma.done.wait [#allocation6], 272  }
  0x6c   :  { %2506 = vsyncadd [#allocation6], 4294967024 }
  0x6d   :  { %2507 = dma.done.wait [#allocation9], 32  }
  0x6e   :  { %2508 = vsyncadd [#allocation9], 4294967264 }
  0x6f   :  { %2509 = dma.done.wait [#allocation12], 7168  }
  0x70   :  { %2510 = vsyncadd [#allocation12], 4294960128  ;;  %v2139_v0 = vld [vmem:[#allocation2 + $0x40] sm:$0xff]   ;;  %v2143_v4 = vld [vmem:[#allocation2 + $0x48] sm:$0xff]   ;;  %v2523_v43 = vmov 0.0   ;;  %vm2524_vm0 = vmmov 0  }
  0x71   :  { %v2140_v1 = vld [vmem:[#allocation2] sm:$0xff]   ;;  %1925 = vmatprep.subr.bf16.mxu0 %v2139_v0  ;;  %v2144_v5 = vld [vmem:[#allocation2 + $0x8] sm:$0xff]   ;;  %v2147_v8 = vld [vmem:[#allocation2 + $0x50] sm:$0xff]   ;;  %vm919_vm1 = vcmask 523264   ;;  %vm990_vm2 = vcmask 261120  }
  0x72   :  { %v2141_v2 = vld [vmem:[#allocation2 + $0xc0] sm:$0xff]   ;;  %1926 = vmatpush3.bf16.msra.mxu0 %v2140_v1  ;;  %v2145_v6 = vld [vmem:[#allocation2 + $0xc8] sm:$0xff]   ;;  %v2148_v9 = vld [vmem:[#allocation2 + $0x10] sm:$0xff]  }
  0x73   :  { %v2142_v3 = vld [vmem:[#allocation2 + $0x80] sm:$0xff]   ;;  %1947 = vmatprep.subr.bf16.mxu1 %v2141_v2  ;;  %1927 = vmatprep.subr.bf16.mxu0 %v2143_v4  ;;  %v2146_v7 = vld [vmem:[#allocation2 + $0x88] sm:$0xff]   ;;  %v2149_v10 = vld [vmem:[#allocation2 + $0xd0] sm:$0xff]  }
  0x74   :  { %1948 = vmatpush3.bf16.msra.mxu1 %v2142_v3  ;;  %v2150_v11 = vld [vmem:[#allocation2 + $0x90] sm:$0xff]   ;;  %v2151_v12 = vld [vmem:[#allocation2 + $0x58] sm:$0xff]   ;;  %v2155_v16 = vld [vmem:[#allocation2 + $0x60] sm:$0xff]  }
  0x75   :  { %1949 = vmatprep.subr.bf16.mxu1 %v2145_v6  ;;  %v2152_v13 = vld [vmem:[#allocation2 + $0x18] sm:$0xff]   ;;  %v2156_v17 = vld [vmem:[#allocation2 + $0x20] sm:$0xff]   ;;  %v2159_v20 = vld [vmem:[#allocation2 + $0x68] sm:$0xff]  }
  0x76   :  { %1928 = vmatpush3.bf16.msra.mxu0 %v2144_v5  ;;  %v2153_v14 = vld [vmem:[#allocation2 + $0xd8] sm:$0xff]   ;;  %v2157_v18 = vld [vmem:[#allocation2 + $0xe0] sm:$0xff]   ;;  %v2160_v21 = vld [vmem:[#allocation2 + $0x28] sm:$0xff]  }
  0x77   :  { %1929 = vmatprep.subr.bf16.mxu0 %v2147_v8  ;;  %v2154_v15 = vld [vmem:[#allocation2 + $0x98] sm:$0xff]   ;;  %v2158_v19 = vld [vmem:[#allocation2 + $0xa0] sm:$0xff]   ;;  %v2161_v22 = vld [vmem:[#allocation2 + $0xe8] sm:$0xff]  }
  0x78   :  { %1950 = vmatpush3.bf16.msra.mxu1 %v2146_v7  ;;  %v2162_v23 = vld [vmem:[#allocation2 + $0xa8] sm:$0xff]   ;;  %v2163_v24 = vld [vmem:[#allocation2 + $0x70] sm:$0xff]   ;;  %v2167_v28 = vld [vmem:[#allocation2 + $0x78] sm:$0xff]  }
  0x79   :  { %1951 = vmatprep.subr.bf16.mxu1 %v2149_v10  ;;  %v2164_v25 = vld [vmem:[#allocation2 + $0x30] sm:$0xff]   ;;  %v2168_v29 = vld [vmem:[#allocation2 + $0x38] sm:$0xff]   ;;  %v123_v31 = vld [vmem:[%s2848_s0 + $0x8] sm:$0xff] }
  0x7a   :  { %1930 = vmatpush3.bf16.msra.mxu0 %v2148_v9  ;;  %v2165_v26 = vld [vmem:[#allocation2 + $0xf0] sm:$0xff]   ;;  %v2169_v30 = vld [vmem:[#allocation2 + $0xf8] sm:$0xff]   ;;  %v130_v32 = vld [vmem:[%s2848_s0 + $0x40] sm:$0xff] }
  0x7b   :  { %1931 = vmatprep.subr.bf16.mxu0 %v2151_v12  ;;  %v2166_v27 = vld [vmem:[#allocation2 + $0xb0] sm:$0xff]   ;;  %v137_v33 = vpack.c.bf16 %v130_v32, %v123_v31  ;;  %v2170_v34 = vld [vmem:[#allocation2 + $0xb8] sm:$0xff]   ;;  %v122_v35 = vld [vmem:[%s2848_s0] sm:$0xff] }
  0x7c   :  { %1952 = vmatpush3.bf16.msra.mxu1 %v2150_v11  ;;  %v129_v36 = vld [vmem:[%s2848_s0 + $0x38] sm:$0xff]  ;;  %v2171_v38 = vld [vmem:[#allocation2 + $0x140] sm:$0xff]   ;;  %v132_v40 = vld [vmem:[%s2848_s0 + $0x50] sm:$0xff] }
  0x7d   :  { %1953 = vmatprep.subr.bf16.mxu1 %v2153_v14  ;;  %630 = vmatprep.mubr.bf16.mxu0 %v137_v33  ;;  %v136_v37 = vpack.c.bf16 %v129_v36, %v122_v35  ;;  %v125_v39 = vld [vmem:[%s2848_s0 + $0x18] sm:$0xff]  ;;  %v2172_v42 = vld [vmem:[#allocation2 + $0x100] sm:$0xff]   ;;  %v124_v44 = vld [vmem:[%s2848_s0 + $0x10] sm:$0xff] }
  0x7e   :  { %1932 = vmatpush3.bf16.msra.mxu0 %v2152_v13  ;;  %v139_v41 = vpack.c.bf16 %v132_v40, %v125_v39  ;;  %v131_v45 = vld [vmem:[%s2848_s0 + $0x48] sm:$0xff]  ;;  %v2173_v47 = vld [vmem:[#allocation2 + $0x180] sm:$0xff]   ;;  %v2177_v51 = vld [vmem:[#allocation2 + $0x150] sm:$0xff]  }
  0x7f   :  { %1933 = vmatprep.subr.bf16.mxu0 %v2155_v16  ;;  %v138_v46 = vpack.c.bf16 %v131_v45, %v124_v44  ;;  %v2174_v48 = vld [vmem:[#allocation2 + $0x148] sm:$0xff]   ;;  %v2178_v52 = vld [vmem:[#allocation2 + $0x110] sm:$0xff]   ;;  %v2180_v54 = vld [vmem:[#allocation2 + $0x158] sm:$0xff]  }
  0x80   :  { %1954 = vmatpush3.bf16.msra.mxu1 %v2154_v15  ;;  %671 = vmatprep.mubr.bf16.mxu1 %v139_v41  ;;  %v2175_v49 = vld [vmem:[#allocation2 + $0x108] sm:$0xff]   ;;  %v2179_v53 = vld [vmem:[#allocation2 + $0x190] sm:$0xff]   ;;  %v2181_v55 = vld [vmem:[#allocation2 + $0x118] sm:$0xff]  }
  0x81   :  { %1955 = vmatprep.subr.bf16.mxu1 %v2157_v18  ;;  %v2176_v50 = vld [vmem:[#allocation2 + $0x188] sm:$0xff]   ;;  %v2183_v56 = vld [vmem:[#allocation2 + $0x160] sm:$0xff]   ;;  %v2182_v57 = vld [vmem:[#allocation2 + $0x198] sm:$0xff]  }
  0x82   :  { %1934 = vmatpush3.bf16.msra.mxu0 %v2156_v17  ;;  %v2184_v58 = vld [vmem:[#allocation2 + $0x120] sm:$0xff]   ;;  %v2186_v59 = vld [vmem:[#allocation2 + $0x168] sm:$0xff]   ;;  %v2189_v62 = vld [vmem:[#allocation2 + $0x170] sm:$0xff]  }
  0x83   :  { %1935 = vmatprep.subr.bf16.mxu0 %v2159_v20  ;;  %v2185_v60 = vld [vmem:[#allocation2 + $0x1a0] sm:$0xff]   ;;  %v2187_v61 = vld [vmem:[#allocation2 + $0x128] sm:$0xff]   ;;  %v2190_v0 = vld [vmem:[#allocation2 + $0x130] sm:$0xff]  }
  0x84   :  { %1956 = vmatpush3.bf16.msra.mxu1 %v2158_v19  ;;  %v2188_v63 = vld [vmem:[#allocation2 + $0x1a8] sm:$0xff]   ;;  %v2192_v1 = vld [vmem:[#allocation2 + $0x178] sm:$0xff]   ;;  %v134_v3 = vld [vmem:[%s2848_s0 + $0x60] sm:$0xff] }
  0x85   :  { %1957 = vmatprep.subr.bf16.mxu1 %v2161_v22  ;;  %v127_v2 = vld [vmem:[%s2848_s0 + $0x28] sm:$0xff]  ;;  %v2191_v4 = vld [vmem:[#allocation2 + $0x1b0] sm:$0xff]   ;;  %v2193_v5 = vld [vmem:[#allocation2 + $0x138] sm:$0xff]  }
  0x86   :  { %1936 = vmatpush3.bf16.msra.mxu0 %v2160_v21  ;;  %v141_v6 = vpack.c.bf16 %v134_v3, %v127_v2  ;;  %v126_v7 = vld [vmem:[%s2848_s0 + $0x20] sm:$0xff]  ;;  %v133_v8 = vld [vmem:[%s2848_s0 + $0x58] sm:$0xff]  ;;  %v128_v10 = vld [vmem:[%s2848_s0 + $0x30] sm:$0xff] }
  0x87   :  { %1937 = vmatprep.subr.bf16.mxu0 %v2163_v24  ;;  %v2194_v9 = vld [vmem:[#allocation2 + $0x1b8] sm:$0xff]   ;;  %v135_v11 = vld [vmem:[%s2848_s0 + $0x68] sm:$0xff]  ;;  %v140_v12 = vpack.c.bf16 %v133_v8, %v126_v7  ;;  %v2195_v14 = vld [vmem:[%s2851_s3] sm:$0xff]  }
  0x88   :  { %1958 = vmatpush3.bf16.msra.mxu1 %v2162_v23  ;;  %v142_v13 = vpack.c.bf16 %v135_v11, %v128_v10  ;;  %v2196_v15 = vld [vmem:[%s2851_s3 + $0x8] sm:$0xff]   ;;  %v2197_v16 = vld [vmem:[%s2851_s3 + $0x10] sm:$0xff]   ;;  %v2198_v17 = vld [vmem:[%s2851_s3 + $0x18] sm:$0xff]  }
  0x89   :  { %1959 = vmatprep.subr.bf16.mxu1 %v2165_v26  ;;  %v2199_v18 = vld [vmem:[%s2851_s3 + $0x20] sm:$0xff]   ;;  %v2200_v19 = vld [vmem:[%s2851_s3 + $0x28] sm:$0xff]   ;;  %v2201_v20 = vld [vmem:[%s2851_s3 + $0x30] sm:$0xff]  }
  0x8a   :  { %1938 = vmatpush3.bf16.msra.mxu0 %v2164_v25  ;;  %v2202_v21 = vld [vmem:[%s2851_s3 + $0x38] sm:$0xff]   ;;  %v2203_v22 = vld [vmem:[%s2853_s5] sm:$0xff]   ;;  %v2204_v23 = vld [vmem:[%s2853_s5 + $0x8] sm:$0xff]  }
  0x8b   :  { %1939 = vmatprep.subr.bf16.mxu0 %v2167_v28  ;;  %v1787_v25 = vld [vmem:[%s2850_s2] ss:$0 sm:$0xff]  ;;  %v2207_v7 = vld [vmem:[#allocation7] sm:$0xff]   ;;  %v2208_v8 = vld [vmem:[#allocation7 + $0x8] sm:$0xff]  }
  0x8c   :  { %1960 = vmatpush3.bf16.msra.mxu1 %v2166_v27 }
  0x8d   :  { %1961 = vmatprep.subr.bf16.mxu1 %v2169_v30 }
  0x8e   :  { %1940 = vmatpush3.bf16.msra.mxu0 %v2168_v29 }
  0x8f   :  { %1969 = vmatprep.subr.bf16.mxu0 %v2171_v38 }
  0x90   :  { %1962 = vmatpush3.bf16.msra.mxu1 %v2170_v34 }
  0x91   :  { %2031 = vmatprep.subr.bf16.mxu1 %v2523_v43  ;;  %631 = vmatmul.mubr.bf16.vlgmr.msra.gmra.mrb[0].mxu0 %v136_v37 }
  0x92   :  { %1970 = vmatpush3.bf16.msra.mxu0 %v2172_v42  ;;  %712 = vmatprep.mubr.bf16.mxu0 %v141_v6 }
  0x93   :  { %672 = vmatmul.mubr.bf16.vlgmr.msra.gmra.mrb[0].mxu1 %v138_v46  ;;  %1971 = vmatprep.subr.bf16.mxu0 %v2174_v48 }
  0x94   :  { %2032 = vmatpush3.bf16.msra.mxu1 %v2173_v47  ;;  %2047 = vmatprep.mubr.msk.bf16.mxu1 %vm2524_vm0, %v2523_v43 }
  0x95   :  { %2033 = vmatprep.subr.bf16.mxu1 %v2523_v43 }
  0x96   :  { %1972 = vmatpush3.bf16.msra.mxu0 %v2175_v49 }
  0x97   :  { %1973 = vmatprep.subr.bf16.mxu0 %v2177_v51 }
  0x98   :  { %2034 = vmatpush3.bf16.msra.mxu1 %v2176_v50 }
  0x99   :  { %2035 = vmatprep.subr.bf16.mxu1 %v2523_v43 }
  0x9a   :  { %1974 = vmatpush3.bf16.msra.mxu0 %v2178_v52 }
  0x9b   :  { %1975 = vmatprep.subr.bf16.mxu0 %v2180_v54 }
  0x9c   :  { %2036 = vmatpush3.bf16.msra.mxu1 %v2179_v53 }
  0x9d   :  { %2037 = vmatprep.subr.bf16.mxu1 %v2523_v43 }
  0x9e   :  { %1976 = vmatpush3.bf16.msra.mxu0 %v2181_v55 }
  0x9f   :  { %1977 = vmatprep.subr.bf16.mxu0 %v2183_v56 }
  0xa0   :  { %2038 = vmatpush3.bf16.msra.mxu1 %v2182_v57 }
  0xa1   :  { %2039 = vmatprep.subr.bf16.mxu1 %v2523_v43 }
  0xa2   :  { %1978 = vmatpush3.bf16.msra.mxu0 %v2184_v58 }
  0xa3   :  { %1979 = vmatprep.subr.bf16.mxu0 %v2186_v59  ;;  %v2205_v59 = vld [vmem:[%s2853_s5 + $0x10] sm:$0xff]  }
  0xa4   :  { %2040 = vmatpush3.bf16.msra.mxu1 %v2185_v60  ;;  %v2206_v60 = vld [vmem:[%s2853_s5 + $0x18] sm:$0xff]  }
  0xa5   :  { %2041 = vmatprep.subr.bf16.mxu1 %v2523_v43 }
  0xa6   :  { %1980 = vmatpush3.bf16.msra.mxu0 %v2187_v61  ;;  %v1844_v61 = vld [vmem:[%s2852_s4] ss:$0 sm:$0xff] }
  0xa7   :  { %1981 = vmatprep.subr.bf16.mxu0 %v2189_v62 }
  0xa8   :  { %2042 = vmatpush3.bf16.msra.mxu1 %v2188_v63 }
  0xa9   :  { %2043 = vmatprep.subr.bf16.mxu1 %v2523_v43 }
  0xaa   :  { %1982 = vmatpush3.bf16.msra.mxu0 %v2190_v0 }
  0xab   :  { %1983 = vmatprep.subr.bf16.mxu0 %v2192_v1 }
  0xac   :  { %2044 = vmatpush3.bf16.msra.mxu1 %v2191_v4 }
  0xad   :  { %2045 = vmatprep.subr.bf16.mxu1 %v2523_v43 }
  0xae   :  { %1984 = vmatpush3.bf16.msra.mxu0 %v2193_v5 }
  0xaf   :  { %2051 = vmatprep.subr.bf16.mxu0 %v2523_v43 }
  0xb0   :  { %2046 = vmatpush3.bf16.msra.mxu1 %v2194_v9  ;;  %v1853_v9 = vld [vmem:[#allocation5] ss:$0 sm:$0xff] }
  0xb1   :  { %713 = vmatmul.mubr.bf16.vlgmr.msra.gmra.mrb[4].mxu0 %v140_v12  ;;  %2071 = vmatprep.subr.bf16.mxu1 %v2523_v43 }
  0xb2   :  { %2067 = vmatprep.mubr.msk.bf16.mxu0 %vm2524_vm0, %v2523_v43  ;;  %2052 = vmatpush3.bf16.msra.mxu0 %v2195_v14 }
  0xb3   :  { %2048 = vmatmul.mubr.bf16.vlgmr.msra.gmra.mrb[4].mxu1 %v142_v13  ;;  %2053 = vmatprep.subr.bf16.mxu0 %v2523_v43 }
  0xb4   :  { %2079 = vmatprep.mubr.msk.bf16.mxu1 %vm2524_vm0, %v2523_v43  ;;  %2072 = vmatpush3.bf16.msra.mxu1 %v2203_v22  ;;  %v2212_v22 = vld [vmem:[%s2857_s9 + $0x18] sm:$0xff]  }
  0xb5   :  { %2073 = vmatprep.subr.bf16.mxu1 %v2523_v43 }
  0xb6   :  { %2054 = vmatpush3.bf16.msra.mxu0 %v2196_v15 }
  0xb7   :  { %2055 = vmatprep.subr.bf16.mxu0 %v2523_v43 }
  0xb8   :  { %2074 = vmatpush3.bf16.msra.mxu1 %v2204_v23  ;;  %v2213_v23 = vld [vmem:[#allocation11] ss:$28 sps:$4 sm:$0xff]  }
  0xb9   :  { %2075 = vmatprep.subr.bf16.mxu1 %v2523_v43 }
  0xba   :  { %2056 = vmatpush3.bf16.msra.mxu0 %v2197_v16 }
  0xbb   :  { %2057 = vmatprep.subr.bf16.mxu0 %v2523_v43 }
  0xbc   :  { %2076 = vmatpush3.bf16.msra.mxu1 %v2205_v59  ;;  %v2254_v59 = vld [vmem:[#allocation11 + $0x15c] ss:$28 sps:$4 sm:$0xff]  }
  0xbd   :  { %2077 = vmatprep.subr.bf16.mxu1 %v2523_v43 }
  0xbe   :  { %2058 = vmatpush3.bf16.msra.mxu0 %v2198_v17 }
  0xbf   :  { %2059 = vmatprep.subr.bf16.mxu0 %v2523_v43 }
  0xc0   :  { %2078 = vmatpush3.bf16.msra.mxu1 %v2206_v60  ;;  %v2249_v60 = vld [vmem:[#allocation11 + $0x150] ss:$28 sps:$4 sm:$0xff]  }
  0xc1   :  { %2083 = vmatprep.subr.bf16.mxu1 %v2523_v43 }
  0xc2   :  { %2060 = vmatpush3.bf16.msra.mxu0 %v2199_v18  ;;  %v2209_v18 = vld [vmem:[%s2857_s9] sm:$0xff]  }
  0xc3   :  { %2061 = vmatprep.subr.bf16.mxu0 %v2523_v43 }
  0xc6   :  { %2062 = vmatpush3.bf16.msra.mxu0 %v2200_v19 }
  0xc7   :  { %2063 = vmatprep.subr.bf16.mxu0 %v2523_v43 }
  0xca   :  { %2064 = vmatpush3.bf16.msra.mxu0 %v2201_v20  ;;  %v2210_v20 = vld [vmem:[%s2857_s9 + $0x8] sm:$0xff]  }
  0xcb   :  { %2065 = vmatprep.subr.bf16.mxu0 %v2523_v43 }
  0xce   :  { %2066 = vmatpush3.bf16.msra.mxu0 %v2202_v21  ;;  %v2211_v21 = vld [vmem:[%s2857_s9 + $0x10] sm:$0xff]  }
 0x164   :  { %v1941_v24 = vpop.f32.mrb[0].mxu0 }
 0x165   :  { %v1942_v26 = vpop.f32.mrb[1].mxu0 }
 0x166   :  { %v1943_v27 = vadd.f32 %v1942_v26, %v1941_v24  ;;  %v1944_v28 = vpop.f32.mrb[2].mxu0  ;;  %v1963_v29 = vpop.f32.mrb[0].mxu1  ;;  %v2215_v24 = vld [vmem:[#allocation11 + $0x4] ss:$28 sps:$4 sm:$0xff]   ;;  %v2221_v26 = vld [vmem:[#allocation11 + $0x3c] ss:$28 sps:$4 sm:$0xff]  }
 0x167   :  { %v1945_v30 = vpop.f32.mrb[3].mxu0  ;;  %v1964_v33 = vpop.f32.mrb[1].mxu1  ;;  %1513 = vmatprep.subr.bf16.mxu0 %v2215_v24  ;;  %v2276_v24 = vld [vmem:[#allocation11 + $0xc0] ss:$28 sps:$4 sm:$0xff]  }
 0x168   :  { %v633_v31 = vadd.f32 %v1943_v27, %v1787_v25  ;;  %v1946_v32 = vadd.f32 %v1945_v30, %v1944_v28  ;;  %v1965_v34 = vadd.f32 %v1964_v33, %v1963_v29  ;;  %v1966_v35 = vpop.f32.mrb[2].mxu1  ;;  %v2219_v27 = vld [vmem:[#allocation11 + $0x38] ss:$28 sps:$4 sm:$0xff]   ;;  %v2225_v29 = vld [vmem:[#allocation11 + $0x70] ss:$28 sps:$4 sm:$0xff]  }
 0x169   :  { %v1967_v37 = vpop.f32.mrb[3].mxu1  ;;  %v2227_v28 = vld [vmem:[#allocation11 + $0x74] ss:$28 sps:$4 sm:$0xff]   ;;  %v2233_v30 = vld [vmem:[#allocation11 + $0xac] ss:$28 sps:$4 sm:$0xff]  }
 0x16a   :  { %v636_v36 = vadd.f32 %v1946_v32, %v1787_v25  ;;  %v674_v38 = vadd.f32 %v1965_v34, %v633_v31  ;;  %v1968_v39 = vadd.f32 %v1967_v37, %v1966_v35  ;;  %v2218_v25 = vld [vmem:[#allocation11 + $0xc] ss:$28 sps:$4 sm:$0xff]   ;;  %v2239_v32 = vld [vmem:[#allocation11 + $0xe4] ss:$28 sps:$4 sm:$0xff]   ;;  %v2245_v34 = vld [vmem:[#allocation11 + $0x11c] ss:$28 sps:$4 sm:$0xff]  }
 0x16b   :  { %v2231_v31 = vld [vmem:[#allocation11 + $0xa8] ss:$28 sps:$4 sm:$0xff]   ;;  %v2237_v33 = vld [vmem:[#allocation11 + $0xe0] ss:$28 sps:$4 sm:$0xff]   ;;  %v2243_v35 = vld [vmem:[#allocation11 + $0x118] ss:$28 sps:$4 sm:$0xff]  }
 0x16c   :  { %v677_v40 = vadd.f32 %v1968_v39, %v636_v36  ;;  %v1859_v36 = vld [vmem:[#allocation8] ss:$0 sm:$0xff] }
 0x184   :  { %v1985_v41 = vpop.f32.mrb[4].mxu0 }
 0x185   :  { %v1986_v42 = vpop.f32.mrb[5].mxu0 }
 0x186   :  { %v1987_v44 = vadd.f32 %v1986_v42, %v1985_v41  ;;  %v1988_v45 = vpop.f32.mrb[6].mxu0  ;;  %v755_v46 = vpop.f32.mrb[4].mxu1 }
 0x187   :  { %v1989_v47 = vpop.f32.mrb[7].mxu0  ;;  %v2049_v50 = vpop.f32.mrb[5].mxu1 }
 0x188   :  { %v715_v48 = vadd.f32 %v1987_v44, %v674_v38  ;;  %v1990_v49 = vadd.f32 %v1989_v47, %v1988_v45  ;;  %v758_v51 = vpop.f32.mrb[6].mxu1  ;;  %v2230_v50 = vld [vmem:[#allocation11 + $0x7c] ss:$28 sps:$4 sm:$0xff]  }
 0x189   :  { %v2050_v54 = vpop.f32.mrb[7].mxu1 }
 0x18a   :  { %v756_v52 = vadd.f32 %v755_v46, %v715_v48  ;;  %v718_v53 = vadd.f32 %v1990_v49, %v677_v40  ;;  %v2216_v46 = vld [vmem:[#allocation11 + $0x8] ss:$28 sps:$4 sm:$0xff]   ;;  %v2222_v49 = vld [vmem:[#allocation11 + $0x40] ss:$28 sps:$4 sm:$0xff]  }
 0x18b   :  { %v2224_v48 = vld [vmem:[#allocation11 + $0x44] ss:$28 sps:$4 sm:$0xff]   ;;  %v2242_v54 = vld [vmem:[#allocation11 + $0xec] ss:$28 sps:$4 sm:$0xff]  }
 0x18c   :  { %v759_v55 = vadd.f32 %v758_v51, %v718_v53  ;;  %v762_v56 = vmax.f32 %v756_v52, 0.0  ;;  %v2228_v51 = vld [vmem:[#allocation11 + $0x78] ss:$28 sps:$4 sm:$0xff]   ;;  %v2234_v53 = vld [vmem:[#allocation11 + $0xb0] ss:$28 sps:$4 sm:$0xff]  }
 0x18d   :  { %v2236_v52 = vld [vmem:[#allocation11 + $0xb4] ss:$28 sps:$4 sm:$0xff]  }
 0x18e   :  { %v763_v57 = vmax.f32 %v759_v55, 0.0  ;;  %v2240_v55 = vld [vmem:[#allocation11 + $0xe8] ss:$28 sps:$4 sm:$0xff]  }
 0x190   :  { %v764_v58 = vpack.c.bf16 %v763_v57, %v762_v56  ;;  %v2248_v56 = vld [vmem:[#allocation11 + $0x124] ss:$28 sps:$4 sm:$0xff]  }
 0x191   :  { %v2246_v57 = vld [vmem:[#allocation11 + $0x120] ss:$28 sps:$4 sm:$0xff]  }
 0x192   :  { %2068 = vmatmul.mubr.bf16.vlgmr.msra.gmra.mrb[8].mxu0 %v764_v58  ;;  %v2251_v58 = vld [vmem:[#allocation11 + $0x154] ss:$28 sps:$4 sm:$0xff]  }
 0x193   :  { %1514 = vmatpush1.bf16.msra.mxu0 %v2213_v23  ;;  %v2273_v23 = vld [vmem:[#allocation11 + $0xb8] ss:$28 sps:$4 sm:$0xff]  }
 0x194   :  { %1515 = vmatprep.subr.bf16.mxu0 %v2221_v26  ;;  %v2277_v26 = vld [vmem:[#allocation11 + $0xf0] ss:$28 sps:$4 sm:$0xff]  }
 0x197   :  { %1516 = vmatpush1.bf16.msra.mxu0 %v2219_v27  ;;  %v2280_v27 = vld [vmem:[#allocation11 + $0xf8] ss:$28 sps:$4 sm:$0xff]  }
 0x198   :  { %1517 = vmatprep.subr.bf16.mxu0 %v2227_v28  ;;  %v2283_v28 = vld [vmem:[#allocation11 + $0x12c] ss:$28 sps:$4 sm:$0xff]  }
 0x19b   :  { %1518 = vmatpush1.bf16.msra.mxu0 %v2225_v29  ;;  %v2281_v29 = vld [vmem:[#allocation11 + $0x128] ss:$28 sps:$4 sm:$0xff]  }
 0x19c   :  { %1519 = vmatprep.subr.bf16.mxu0 %v2233_v30  ;;  %v2284_v30 = vld [vmem:[#allocation11 + $0x130] ss:$28 sps:$4 sm:$0xff]  }
 0x19f   :  { %1520 = vmatpush1.bf16.msra.mxu0 %v2231_v31  ;;  %v2287_v31 = vld [vmem:[#allocation11 + $0x164] ss:$28 sps:$4 sm:$0xff]  }
 0x1a0   :  { %1521 = vmatprep.subr.bf16.mxu0 %v2239_v32  ;;  %v2285_v32 = vld [vmem:[#allocation11 + $0x160] ss:$28 sps:$4 sm:$0xff]  }
 0x1a3   :  { %1522 = vmatpush1.bf16.msra.mxu0 %v2237_v33  ;;  %v2288_v33 = vld [vmem:[#allocation11 + $0x168] ss:$28 sps:$4 sm:$0xff]  }
 0x1a4   :  { %1523 = vmatprep.subr.bf16.mxu0 %v2245_v34  ;;  %v2291_v34 = vld [vmem:[#allocation11 + $0x19c] ss:$28 sps:$4 sm:$0xff]  }
 0x1a7   :  { %1524 = vmatpush1.bf16.msra.mxu0 %v2243_v35  ;;  %v2289_v35 = vld [vmem:[#allocation11 + $0x198] ss:$28 sps:$4 sm:$0xff]  }
 0x1a8   :  { %1525 = vmatprep.subr.bf16.mxu0 %v2251_v58 }
 0x1ab   :  { %1526 = vmatpush1.bf16.msra.mxu0 %v2249_v60 }
 0x265   :  { %v870_v62 = vpop.f32.mrb[8].mxu0 }
 0x266   :  { %v871_v63 = vadd.f32 %v1844_v61, %v870_v62  ;;  %v2069_v0 = vpop.f32.mrb[9].mxu0  ;;  %v2257_v62 = vld [vmem:[#allocation11 + $0x18c] ss:$28 sps:$4 sm:$0xff]  }
 0x267   :  { %v873_v1 = vpop.f32.mrb[10].mxu0  ;;  %v2255_v0 = vld [vmem:[#allocation11 + $0x188] ss:$28 sps:$4 sm:$0xff]   ;;  %1527 = vmatprep.subr.bf16.mxu0 %v2257_v62 }
 0x268   :  { %v874_v2 = vadd.f32 %v1844_v61, %v873_v1  ;;  %v2070_v3 = vpop.f32.mrb[11].mxu0  ;;  %v877_v4 = vmax.f32 %v871_v63, 0.0  ;;  %v2252_v61 = vld [vmem:[#allocation11 + $0x158] ss:$28 sps:$4 sm:$0xff]   ;;  %v2258_v1 = vld [vmem:[#allocation11 + $0x190] ss:$28 sps:$4 sm:$0xff]   ;;  %1528 = vmatpush1.bf16.msra.mxu0 %v2255_v0 }
 0x269   :  { %v2260_v63 = vld [vmem:[#allocation11 + $0x194] ss:$28 sps:$4 sm:$0xff]   ;;  %v2525_v3 = vmov 0  }
 0x26a   :  { %v878_v5 = vmax.f32 %v874_v2, 0.0  ;;  %v2263_v2 = vld [vmem:[#allocation11 + $0x14] ss:$28 sps:$4 sm:$0xff]   ;;  %1545 = vmatprep.mubr.bf16.mxu0 %v2525_v3 }
 0x26b   :  { %1599 = vmatprep.subr.bf16.mxu0 %v2263_v2 }
 0x26c   :  { %v879_v6 = vpack.c.bf16 %v878_v5, %v877_v4  ;;  %v1863_v4 = vld [vmem:[#allocation10] ss:$0 sm:$0xff] }
 0x26e   :  { %2080 = vmatmul.mubr.msk.bf16.vlgmr.msra.gmra.mrb[8].mxu1 %vm919_vm1, %v879_v6 }
 0x26f   :  { %2087 = vmatprep.mubr.msk.bf16.mxu1 %vm2524_vm0, %v2523_v43  ;;  %2084 = vmatpush3.bf16.msra.mxu1 %v2207_v7 }
 0x270   :  { %2085 = vmatprep.subr.bf16.mxu1 %v2523_v43 }
 0x273   :  { %2086 = vmatpush3.bf16.msra.mxu1 %v2208_v8 }
 0x274   :  { %2091 = vmatprep.subr.bf16.mxu1 %v2523_v43 }
 0x341   :  { %v957_v10 = vpop.f32.mrb[8].mxu1 }
 0x342   :  { %v958_v11 = vadd.f32 %v1853_v9, %v957_v10  ;;  %v2081_v12 = vpop.f32.mrb[9].mxu1 }
 0x343   :  { %v960_v13 = vpop.f32.mrb[10].mxu1 }
 0x344   :  { %v961_v14 = vadd.f32 %v1853_v9, %v960_v13  ;;  %v2082_v15 = vpop.f32.mrb[11].mxu1  ;;  %v964_v16 = vmax.f32 %v958_v11, 0.0  ;;  %v2261_v13 = vld [vmem:[#allocation11 + $0x10] ss:$28 sps:$4 sm:$0xff]  }
 0x346   :  { %v965_v17 = vmax.f32 %v961_v14, 0.0  ;;  %v2264_v14 = vld [vmem:[#allocation11 + $0x18] ss:$28 sps:$4 sm:$0xff]  }
 0x348   :  { %v966_v19 = vpack.c.bf16 %v965_v17, %v964_v16  ;;  %v2267_v16 = vld [vmem:[#allocation11 + $0x4c] ss:$28 sps:$4 sm:$0xff]  }
 0x349   :  { %v2265_v17 = vld [vmem:[#allocation11 + $0x48] ss:$28 sps:$4 sm:$0xff]  }
 0x34a   :  { %2088 = vmatmul.mubr.msk.bf16.vlgmr.msra.gmra.mrb[12].mxu1 %vm990_vm2, %v966_v19  ;;  %v2271_v19 = vld [vmem:[#allocation11 + $0x84] ss:$28 sps:$4 sm:$0xff]  }
 0x34b   :  { %2092 = vmatpush3.bf16.msra.mxu1 %v2209_v18  ;;  %2099 = vmatprep.mubr.msk.bf16.mxu1 %vm2524_vm0, %v2523_v43  ;;  %v2268_v18 = vld [vmem:[#allocation11 + $0x50] ss:$28 sps:$4 sm:$0xff]  }
 0x34c   :  { %2093 = vmatprep.subr.bf16.mxu1 %v2523_v43 }
 0x34f   :  { %2094 = vmatpush3.bf16.msra.mxu1 %v2210_v20  ;;  %v2269_v20 = vld [vmem:[#allocation11 + $0x80] ss:$28 sps:$4 sm:$0xff]  }
 0x350   :  { %2095 = vmatprep.subr.bf16.mxu1 %v2523_v43 }
 0x353   :  { %2096 = vmatpush3.bf16.msra.mxu1 %v2211_v21  ;;  %v2272_v21 = vld [vmem:[#allocation11 + $0x88] ss:$28 sps:$4 sm:$0xff]  }
 0x354   :  { %2097 = vmatprep.subr.bf16.mxu1 %v2523_v43 }
 0x357   :  { %2098 = vmatpush3.bf16.msra.mxu1 %v2212_v22  ;;  %v2275_v22 = vld [vmem:[#allocation11 + $0xbc] ss:$28 sps:$4 sm:$0xff]  }
 0x358   :  { %1556 = vmatprep.subr.bf16.mxu1 %v2218_v25  ;;  %v2279_v25 = vld [vmem:[#allocation11 + $0xf4] ss:$28 sps:$4 sm:$0xff]  }
 0x41d   :  { %v1028_v37 = vpop.f32.mrb[12].mxu1 }
 0x41e   :  { %v1029_v38 = vadd.f32 %v1859_v36, %v1028_v37  ;;  %v2089_v39 = vpop.f32.mrb[13].mxu1  ;;  %v1190_v37 = vlaneseq }
 0x41f   :  { %v1031_v40 = vpop.f32.mrb[14].mxu1 }
 0x420   :  { %v1032_v41 = vadd.f32 %v1859_v36, %v1031_v40  ;;  %v2090_v42 = vpop.f32.mrb[15].mxu1  ;;  %v1035_v44 = vmax.f32 %v1029_v38, 0.0  ;;  %v2292_v36 = vld [vmem:[#allocation11 + $0x1a0] ss:$28 sps:$4 sm:$0xff]   ;;  %v2815_v38 = vshrl.u32 %v1190_v37, 7 }
 0x422   :  { %v1036_v45 = vmax.f32 %v1032_v41, 0.0  ;;  %v1192_v39 = vsub.s32 0, %v2815_v38  ;;  %v1200_v40 = vsub.s32 2, %v2815_v38  ;;  %v2822_v41 = vld [vmem:[%s2860_s12] sm:$0xff]  ;;  %v1196_v42 = vsub.s32 1, %v2815_v38  ;;  %s2526_s12 = smov [#allocation13]  }
 0x423   :  { %s1772_s22 = sshll.u32 %s2526_s12, 4  ;;  %s1773_s22 = int_to_ptr.vmem [resolvable:$true] %s1772_s22 }
 0x424   :  { %v1037_v47 = vpack.c.bf16 %v1036_v45, %v1035_v44  ;;  %v1193_v44 = vrot.slane %v2822_v41, %v1192_v39  ;;  %v1201_v45 = vrot.slane %v2822_v41, %v1200_v40  ;;  %s2481_s23 = scalar_lea.vmem %s1773_s22, 1792  ;;  %p2486_p7 = scmp.lt.s32.totalorder %s1773_s22, %s1773_s22 }
 0x425   :  { %p2482_p6 = scmp.ne.s32.totalorder %s1773_s22, %s2481_s23  ;;  %p2487_p8 = scmp.lt.s32.totalorder %s2481_s23, %s2481_s23 }
 0x426   :  { %2100 = vmatmul.mubr.msk.bf16.vlgmr.msra.gmra.mrb[16].mxu1 %vm919_vm1, %v1037_v47 }
 0x427   :  { %1557 = vmatpush1.bf16.msra.mxu1 %v2216_v46  ;;  %1588 = vmatprep.mubr.bf16.mxu1 %v2525_v3  ;;  %v1197_v46 = vrot.slane %v2822_v41, %v1196_v42  ;;  %p2488_p9 = por %p2487_p8, %p2486_p7 }
 0x428   :  { %1558 = vmatprep.subr.bf16.mxu1 %v2224_v48 }
 0x429   :  { %p2489_p10 = pnand %p2488_p9, %p2482_p6 }
 0x42b   :  { %1559 = vmatpush1.bf16.msra.mxu1 %v2222_v49 }
 0x42c   :  { %1560 = vmatprep.subr.bf16.mxu1 %v2230_v50 }
 0x42f   :  { %1561 = vmatpush1.bf16.msra.mxu1 %v2228_v51 }
 0x430   :  { %1562 = vmatprep.subr.bf16.mxu1 %v2236_v52 }
 0x433   :  { %1563 = vmatpush1.bf16.msra.mxu1 %v2234_v53 }
 0x434   :  { %1564 = vmatprep.subr.bf16.mxu1 %v2242_v54 }
 0x437   :  { %1565 = vmatpush1.bf16.msra.mxu1 %v2240_v55 }
 0x438   :  { %1566 = vmatprep.subr.bf16.mxu1 %v2248_v56 }
 0x43b   :  { %1567 = vmatpush1.bf16.msra.mxu1 %v2246_v57 }
 0x43c   :  { %1568 = vmatprep.subr.bf16.mxu1 %v2254_v59 }
 0x43f   :  { %1569 = vmatpush1.bf16.msra.mxu1 %v2252_v61 }
 0x440   :  { %1570 = vmatprep.subr.bf16.mxu1 %v2260_v63 }
 0x443   :  { %1571 = vmatpush1.bf16.msra.mxu1 %v2258_v1 }
 0x444   :  { %2103 = vmatprep.subr.bf16.mxu1 %v2523_v43 }
 0x4f9   :  { %v1114_v5 = vpop.f32.mrb[16].mxu1 }
 0x4fa   :  { %v1115_v6 = vadd.f32 %v1863_v4, %v1114_v5  ;;  %v2101_v7 = vpop.f32.mrb[17].mxu1 }
 0x4fb   :  { %v1117_v8 = vpop.f32.mrb[18].mxu1 }
 0x4fc   :  { %v1118_v9 = vadd.f32 %v1863_v4, %v1117_v8  ;;  %v2102_v10 = vpop.f32.mrb[19].mxu1  ;;  %v1121_v11 = vmax.f32 %v1115_v6, 0.0 }
 0x4fe   :  { %v1122_v12 = vmax.f32 %v1118_v9, 0.0 }
 0x500   :  { %v1123_v15 = vpack.c.bf16 %v1122_v12, %v1121_v11 }
 0x502   :  { %1546 = vmatmul.mubr.bf16.vlgmr.msra.gmra.mrb[12].mxu0 %v1123_v15  ;;  %1589 = vmatmul.mubr.bf16.vlgmr.msra.gmra.mrb[20].mxu1 %v1123_v15 }
 0x503   :  { %1600 = vmatpush1.bf16.msra.mxu0 %v2261_v13  ;;  %2104 = vmatpush3.bf16.msra.mxu1 %v2264_v14 }
 0x504   :  { %1601 = vmatprep.subr.bf16.mxu0 %v2267_v16  ;;  %2105 = vmatprep.subr.bf16.mxu1 %v2523_v43 }
 0x505   :  { %1631 = vmatprep.mubr.bf16.mxu0 %v2525_v3  ;;  %2119 = vmatprep.mubr.msk.bf16.mxu1 %vm2524_vm0, %v2523_v43 }
 0x507   :  { %1602 = vmatpush1.bf16.msra.mxu0 %v2265_v17  ;;  %2106 = vmatpush3.bf16.msra.mxu1 %v2268_v18 }
 0x508   :  { %1603 = vmatprep.subr.bf16.mxu0 %v2271_v19  ;;  %2107 = vmatprep.subr.bf16.mxu1 %v2523_v43 }
 0x50b   :  { %1604 = vmatpush1.bf16.msra.mxu0 %v2269_v20  ;;  %2108 = vmatpush3.bf16.msra.mxu1 %v2272_v21 }
 0x50c   :  { %1605 = vmatprep.subr.bf16.mxu0 %v2275_v22  ;;  %2109 = vmatprep.subr.bf16.mxu1 %v2523_v43 }
 0x50f   :  { %1606 = vmatpush1.bf16.msra.mxu0 %v2273_v23  ;;  %2110 = vmatpush3.bf16.msra.mxu1 %v2276_v24 }
 0x510   :  { %1607 = vmatprep.subr.bf16.mxu0 %v2279_v25  ;;  %2111 = vmatprep.subr.bf16.mxu1 %v2523_v43 }
 0x513   :  { %1608 = vmatpush1.bf16.msra.mxu0 %v2277_v26  ;;  %2112 = vmatpush3.bf16.msra.mxu1 %v2280_v27 }
 0x514   :  { %1609 = vmatprep.subr.bf16.mxu0 %v2283_v28  ;;  %2113 = vmatprep.subr.bf16.mxu1 %v2523_v43 }
 0x517   :  { %1610 = vmatpush1.bf16.msra.mxu0 %v2281_v29  ;;  %2114 = vmatpush3.bf16.msra.mxu1 %v2284_v30 }
 0x518   :  { %1611 = vmatprep.subr.bf16.mxu0 %v2287_v31  ;;  %2115 = vmatprep.subr.bf16.mxu1 %v2523_v43 }
 0x51b   :  { %1612 = vmatpush1.bf16.msra.mxu0 %v2285_v32  ;;  %2116 = vmatpush3.bf16.msra.mxu1 %v2288_v33  ;;  %v1208_v32 = vsub.s32 4, %v2815_v38  ;;  %v1216_v33 = vsub.s32 6, %v2815_v38 }
 0x51c   :  { %1613 = vmatprep.subr.bf16.mxu0 %v2291_v34  ;;  %2117 = vmatprep.subr.bf16.mxu1 %v2523_v43  ;;  %v1204_v43 = vsub.s32 3, %v2815_v38  ;;  %v1212_v34 = vsub.s32 5, %v2815_v38 }
 0x51e   :  { %v1205_v47 = vrot.slane %v2822_v41, %v1204_v43  ;;  %v1213_v39 = vrot.slane %v2822_v41, %v1212_v34 }
 0x51f   :  { %1614 = vmatpush1.bf16.msra.mxu0 %v2289_v35  ;;  %2118 = vmatpush3.bf16.msra.mxu1 %v2292_v36  ;;  %v1209_v35 = vrot.slane %v2822_v41, %v1208_v32  ;;  %v1217_v36 = vrot.slane %v2822_v41, %v1216_v33 }
 0x522   :  { %1632 = vmatmul.mubr.bf16.vlgmr.msra.gmra.mrb[16].mxu0 %v1123_v15  ;;  %2120 = vmatmul.mubr.bf16.vlgmr.msra.gmra.mrb[24].mxu1 %v1123_v15 }
 0x5d5   :  { %v1547_v48 = vpop.f32.mrb[12].mxu0  ;;  %v1590_v49 = vpop.f32.mrb[20].mxu1 }
 0x5d6   :  { %v1548_v50 = vadd.f32 %v1547_v48, %v1193_v44  ;;  %v1591_v51 = vadd.f32 %v1590_v49, %v1201_v45  ;;  %v1549_v52 = vpop.f32.mrb[13].mxu0  ;;  %v1592_v53 = vpop.f32.mrb[21].mxu1 }
 0x5d7   :  { %v1550_v54 = vadd.f32 %v1549_v52, %v1197_v46  ;;  %v1593_v55 = vadd.f32 %v1592_v53, %v1205_v47  ;;  %v1551_v56 = vpop.f32.mrb[14].mxu0  ;;  %v1594_v57 = vpop.f32.mrb[22].mxu1 }
 0x5d8   :  { %v1683_v58 = vsub.f32 0.0, %v1548_v50  ;;  %v1685_v59 = vsub.f32 0.0, %v1591_v51  ;;  %v1552_v60 = vadd.f32 %v1551_v56, %v1193_v44  ;;  %v1595_v61 = vadd.f32 %v1594_v57, %v1201_v45  ;;  %v1553_v62 = vpop.f32.mrb[15].mxu0  ;;  %v1596_v63 = vpop.f32.mrb[23].mxu1 }
 0x5d9   :  { %v1684_v0 = vsub.f32 0.0, %v1550_v54  ;;  %v1686_v1 = vsub.f32 0.0, %v1593_v55  ;;  %v1554_v2 = vadd.f32 %v1553_v62, %v1197_v46  ;;  %v1597_v3 = vadd.f32 %v1596_v63, %v1205_v47 }
 0x5da   :  { %v1697_v4 = vmul.f32 1.442695, %v1683_v58  ;;  %v1701_v5 = vmul.f32 1.442695, %v1685_v59  ;;  %v1690_v6 = vsub.f32 0.0, %v1552_v60  ;;  %v1692_v7 = vsub.f32 0.0, %v1595_v61 }
 0x5db   :  { %v1699_v8 = vmul.f32 1.442695, %v1684_v0  ;;  %v1703_v9 = vmul.f32 1.442695, %v1686_v1  ;;  %v1691_v10 = vsub.f32 0.0, %v1554_v2  ;;  %v1693_v11 = vsub.f32 0.0, %v1597_v3 }
 0x5dc   :  { %2293 = vpow2.f32 %v1697_v4  ;;  %v1711_v12 = vmul.f32 1.442695, %v1690_v6  ;;  %v1715_v13 = vmul.f32 1.442695, %v1692_v7 }
 0x5dd   :  { %2295 = vpow2.f32 %v1701_v5  ;;  %v1713_v14 = vmul.f32 1.442695, %v1691_v10  ;;  %v1717_v15 = vmul.f32 1.442695, %v1693_v11 }
 0x5de   :  { %2297 = vpow2.f32 %v1699_v8 }
 0x5df   :  { %2299 = vpow2.f32 %v1703_v9 }
 0x5e0   :  { %2301 = vpow2.f32 %v1711_v12 }
 0x5e1   :  { %2303 = vpow2.f32 %v1715_v13 }
 0x5e2   :  { %2305 = vpow2.f32 %v1713_v14 }
 0x5e3   :  { %2307 = vpow2.f32 %v1717_v15 }
 0x5e6   :  { %v2294_v16 = vpop.eup %2293 }
 0x5e7   :  { %v2296_v17 = vpop.eup %2295  ;;  %v1725_v18 = vadd.f32 1.0, %v2294_v16 }
 0x5e8   :  { %v2298_v19 = vpop.eup %2297  ;;  %v1727_v20 = vadd.f32 1.0, %v2296_v17 }
 0x5e9   :  { %v2300_v21 = vpop.eup %2299  ;;  %2309 = vrcp.f32 %v1725_v18  ;;  %v1726_v22 = vadd.f32 1.0, %v2298_v19 }
 0x5ea   :  { %v2302_v23 = vpop.eup %2301  ;;  %2311 = vrcp.f32 %v1727_v20  ;;  %v1728_v24 = vadd.f32 1.0, %v2300_v21 }
 0x5eb   :  { %v2304_v25 = vpop.eup %2303  ;;  %2313 = vrcp.f32 %v1726_v22  ;;  %v1732_v26 = vadd.f32 1.0, %v2302_v23 }
 0x5ec   :  { %v2306_v27 = vpop.eup %2305  ;;  %2315 = vrcp.f32 %v1728_v24  ;;  %v1734_v28 = vadd.f32 1.0, %v2304_v25 }
 0x5ed   :  { %v2308_v29 = vpop.eup %2307  ;;  %2317 = vrcp.f32 %v1732_v26  ;;  %v1733_v30 = vadd.f32 1.0, %v2306_v27 }
 0x5ee   :  { %2319 = vrcp.f32 %v1734_v28  ;;  %v1735_v31 = vadd.f32 1.0, %v2308_v29 }
 0x5ef   :  { %2321 = vrcp.f32 %v1733_v30 }
 0x5f0   :  { %2323 = vrcp.f32 %v1735_v31 }
 0x5f3   :  { %v2310_v37 = vpop.eup %2309 }
 0x5f4   :  { %v2312_v40 = vpop.eup %2311  ;;  %1753 = vst [vmem:[#allocation13] sm:$0xff] %v2310_v37 }
 0x5f5   :  { %v2314_v42 = vpop.eup %2313  ;;  %1755 = vst [vmem:[#allocation13 + $0x10] sm:$0xff] %v2312_v40  ;;  %v1633_v43 = vpop.f32.mrb[16].mxu0 }
 0x5f6   :  { %v1676_v44 = vpop.f32.mrb[24].mxu1  ;;  %v2316_v45 = vpop.eup %2315  ;;  %1754 = vst [vmem:[#allocation13 + $0x8] sm:$0xff] %v2314_v42  ;;  %v1634_v46 = vadd.f32 %v1633_v43, %v1209_v35 }
 0x5f7   :  { %v1677_v47 = vadd.f32 %v1676_v44, %v1217_v36  ;;  %v1635_v48 = vpop.f32.mrb[17].mxu0  ;;  %v2121_v38 = vpop.f32.mrb[25].mxu1  ;;  %1756 = vst [vmem:[#allocation13 + $0x18] sm:$0xff] %v2316_v45 }
 0x5f8   :  { %v2318_v49 = vpop.eup %2317  ;;  %v1636_v50 = vadd.f32 %v1635_v48, %v1213_v39  ;;  %v1637_v51 = vpop.f32.mrb[18].mxu0  ;;  %v1687_v41 = vsub.f32 0.0, %v1634_v46 }
 0x5f9   :  { %v1679_v52 = vpop.f32.mrb[26].mxu1  ;;  %v2320_v53 = vpop.eup %2319  ;;  %1760 = vst [vmem:[#allocation13 + $0x38] sm:$0xff] %v2318_v49  ;;  %v1689_v54 = vsub.f32 0.0, %v1677_v47  ;;  %v1638_v55 = vadd.f32 %v1637_v51, %v1209_v35 }
 0x5fa   :  { %v1680_v56 = vadd.f32 %v1679_v52, %v1217_v36  ;;  %v1639_v57 = vpop.f32.mrb[19].mxu0  ;;  %v2122_v58 = vpop.f32.mrb[27].mxu1  ;;  %1762 = vst [vmem:[#allocation13 + $0x48] sm:$0xff] %v2320_v53  ;;  %v1688_v60 = vsub.f32 0.0, %v1636_v50  ;;  %v1705_v63 = vmul.f32 1.442695, %v1687_v41 }
 0x5fb   :  { %v2322_v59 = vpop.eup %2321  ;;  %v1640_v61 = vadd.f32 %v1639_v57, %v1213_v39  ;;  %v1709_v0 = vmul.f32 1.442695, %v1689_v54  ;;  %v1694_v1 = vsub.f32 0.0, %v1638_v55 }
 0x5fc   :  { %v2324_v62 = vpop.eup %2323  ;;  %1761 = vst [vmem:[#allocation13 + $0x40] sm:$0xff] %v2322_v59  ;;  %v1696_v2 = vsub.f32 0.0, %v1680_v56  ;;  %v1707_v3 = vmul.f32 1.442695, %v1688_v60  ;;  %2325 = vpow2.f32 %v1705_v63 }
 0x5fd   :  { %1763 = vst [vmem:[#allocation13 + $0x50] sm:$0xff] %v2324_v62  ;;  %v1695_v4 = vsub.f32 0.0, %v1640_v61  ;;  %v1719_v5 = vmul.f32 1.442695, %v1694_v1  ;;  %2327 = vpow2.f32 %v1709_v0 }
 0x5fe   :  { %v1723_v6 = vmul.f32 1.442695, %v1696_v2  ;;  %2329 = vpow2.f32 %v1707_v3 }
 0x5ff   :  { %v1721_v7 = vmul.f32 1.442695, %v1695_v4  ;;  %2331 = vpow2.f32 %v1719_v5 }
 0x600   :  { %2333 = vpow2.f32 %v1723_v6 }
 0x601   :  { %2335 = vpow2.f32 %v1721_v7 }
 0x606   :  { %v2326_v8 = vpop.eup %2325 }
 0x607   :  { %v2328_v9 = vpop.eup %2327  ;;  %v1729_v10 = vadd.f32 1.0, %v2326_v8 }
 0x608   :  { %v2330_v11 = vpop.eup %2329  ;;  %v1731_v12 = vadd.f32 1.0, %v2328_v9 }
 0x609   :  { %v2332_v13 = vpop.eup %2331  ;;  %2337 = vrcp.f32 %v1729_v10  ;;  %v1730_v14 = vadd.f32 1.0, %v2330_v11 }
 0x60a   :  { %v2334_v15 = vpop.eup %2333  ;;  %2339 = vrcp.f32 %v1731_v12  ;;  %v1736_v16 = vadd.f32 1.0, %v2332_v13 }
 0x60b   :  { %v2336_v17 = vpop.eup %2335  ;;  %2341 = vrcp.f32 %v1730_v14  ;;  %v1738_v18 = vadd.f32 1.0, %v2334_v15 }
 0x60c   :  { %2343 = vrcp.f32 %v1736_v16  ;;  %v1737_v19 = vadd.f32 1.0, %v2336_v17 }
 0x60d   :  { %2345 = vrcp.f32 %v1738_v18 }
 0x60e   :  { %2347 = vrcp.f32 %v1737_v19 }
 0x613   :  { %v2338_v20 = vpop.eup %2337 }
 0x614   :  { %v2340_v21 = vpop.eup %2339  ;;  %1757 = vst [vmem:[#allocation13 + $0x20] sm:$0xff] %v2338_v20 }
 0x615   :  { %v2342_v22 = vpop.eup %2341  ;;  %1759 = vst [vmem:[#allocation13 + $0x30] sm:$0xff] %v2340_v21 }
 0x616   :  { %v2344_v23 = vpop.eup %2343  ;;  %1758 = vst [vmem:[#allocation13 + $0x28] sm:$0xff] %v2342_v22 }
 0x617   :  { %v2346_v24 = vpop.eup %2345  ;;  %1764 = vst [vmem:[#allocation13 + $0x58] sm:$0xff] %v2344_v23 }
 0x618   :  { %v2348_v25 = vpop.eup %2347  ;;  %1766 = vst [vmem:[#allocation13 + $0x68] sm:$0xff] %v2346_v24 }
 0x619   :  { %1765 = vst [vmem:[#allocation13 + $0x60] sm:$0xff] %v2348_v25 }
 0x61a   :  { %2492 = shalt.err (!%p2489_p10)
}
 0x61b   :  { %s2493_s24 = scalar_lea.hbm %s2861_s13, 1792 }
 0x61c   :  { %p2494_p11 = scmp.ne.s32.totalorder %s2861_s13, %s2493_s24  ;;  %p2497_p12 = scmp.lt.u32.totalorder %s2493_s24, %s2861_s13 }
 0x61e   :  { %p2499_p13 = pnand %p2497_p12, %p2494_p11 }
 0x620   :  { %2502 = shalt.err (!%p2499_p13)
}
 0x621   :  { %s2527_s29 = smov 896   ;;  %s2528_s11 = smov 56  }
 0x622   :  { %1778 = dma.vmem_to_hbm [thread:$0]  %s1773_s22, 1792, %s2861_s13, [#allocation4], %s2527_s29, %s2527_s29, %s2528_s11  }
 0x623   :  { %2511 = dma.done.wait [#allocation4], 1792  }
 0x624   :  { %2512 = vsyncadd [#allocation4], 4294965504 }
 0x625   :  { %1782 = vsyncpa [#allocation3], 1 }
 0x626   :  { %1783 = vsyncpa [#allocation6], 1 }
 0x627   :  { %1784 = vsyncpa [#allocation9], 1 }
 0x628   :  { %1785 = vsyncpa [#allocation12], 1 }
 0x629   :  { %1786 = vsyncpa [#allocation4], 1 }

</bundles_post_ra>
